<compile_context>
chip_gen: v6e
topology: v6e:2x2x1
jax: 0.10.0
libtpu: 0.0.40
codegen_flags: <defaults>
</compile_context>

<pallas_src>
import math
from typing import Optional

import numpy as np
import jax
import jax.numpy as jnp
from jax.experimental import pallas as pl
from jax.experimental.pallas import tpu as pltpu


# ----------------------------------------------------------------------------
# Filter construction (deterministic, mirrors ResampleFrac._init_kernels)
# ----------------------------------------------------------------------------
def _round_up(x: int, m: int) -> int:
    return ((x + m - 1) // m) * m


def _sinc_np(t):
    out = np.ones_like(t)
    nz = t != 0
    out[nz] = np.sin(t[nz]) / t[nz]
    return out


def build_resample_filter(old_sr: int, new_sr: int, zeros: int = 24,
                          rolloff: float = 0.945):
    """Returns (kernel [new_sr, K] np.float32, width, old_sr, new_sr) after GCD."""
    gcd = math.gcd(old_sr, new_sr)
    old_sr //= gcd
    new_sr //= gcd
    if old_sr == new_sr:
        return None, 0, old_sr, new_sr
    sr = min(new_sr, old_sr) * rolloff
    width = math.ceil(zeros * old_sr / sr)
    idx = np.arange(-width, width + old_sr, dtype=np.float64)
    kernels = []
    for i in range(new_sr):
        t = (-i / new_sr + idx / old_sr) * sr
        t = np.clip(t, -zeros, zeros) * math.pi
        window = np.cos(t / zeros / 2) ** 2
        k = _sinc_np(t) * window
        k = k / k.sum()
        kernels.append(k)
    kernel = np.stack(kernels).astype(np.float32)   # [new_sr, K], K = 2*width + old
    return kernel, width, old_sr, new_sr


def _build_banded_weights(kernel_np, width, old, new, target_lanes=512,
                          max_contract=8192):
    """Unroll the strided conv over G frames into banded weight matrices.

    out[row, f*new + i] = sum_k chunk[row, f*old + k] * kernel[i, k]
    split into W_body [Lb, N_pad] (non-overlapping part of the chunk) and
    W_halo [Lh, N_pad] (overlap into the next chunk, zero past `halo` rows).
    """
    K = kernel_np.shape[1]              # 2*width + old
    halo = K - old                      # = 2*width
    # frames per chunk: ~target_lanes output cols, snapped so N is a 128-multiple
    G = max(1, -(-target_lanes // new))
    G = max(G, -(-halo // old))         # ensure Lb >= halo (halo fits in one chunk)
    g2 = 128 // math.gcd(new, 128)
    G_snap = -(-G // g2) * g2
    if G_snap * new <= 4 * target_lanes and G_snap * old <= max_contract:
        G = G_snap
    N = G * new                         # valid output columns per chunk
    N_pad = _round_up(N, 128)           # lane-dense output width (== N after snap)
    Lb = G * old                        # body samples per chunk
    Lh = min(_round_up(halo, 128), Lb)  # halo operand width

    w_full = np.zeros((Lb + halo, N_pad), np.float32)
    k_t = kernel_np.T                   # [K, new]
    for f in range(G):
        w_full[f * old: f * old + K, f * new: (f + 1) * new] = k_t
    w_body = np.ascontiguousarray(w_full[:Lb])
    w_halo = np.zeros((Lh, N_pad), np.float32)
    w_halo[:halo] = w_full[Lb:]
    return w_body, w_halo, G, N, N_pad, Lb, halo, Lh


# ----------------------------------------------------------------------------
# Pallas kernel: per (batch, chunk-block) tile  out = body @ Wb + halo @ Wh
# ----------------------------------------------------------------------------
def _banded_mm_kernel(body_ref, halo_ref, wb_ref, wh_ref, out_ref):
    # body_ref: [CT, Lb] bf16, halo_ref: [CT, Lh] bf16,
    # wb_ref: [Lb, N] bf16, wh_ref: [Lh, N] bf16, out_ref: [CT, N]
    acc = jnp.dot(body_ref[...], wb_ref[...], preferred_element_type=jnp.float32)
    acc = acc + jnp.dot(halo_ref[...], wh_ref[...],
                        preferred_element_type=jnp.float32)
    out_ref[...] = acc.astype(out_ref.dtype)


def _banded_matmul(xp3, halo3, wb, wh, CT, nblk, out_dtype):
    B, _, Lb = xp3.shape                   # xp3: [B, n_chunks_pad + 1, Lb]
    _, n_chunks_pad, Lh = halo3.shape      # halo3: [B, n_chunks_pad, Lh]
    _, N_pad = wb.shape
    return pl.pallas_call(
        _banded_mm_kernel,
        out_shape=jax.ShapeDtypeStruct((B, n_chunks_pad, N_pad), out_dtype),
        grid=(B, nblk),
        in_specs=[
            # body: zero-copy view of the padded signal; the extra trailing
            # chunk (index n_chunks_pad) is never selected by the grid.
            pl.BlockSpec((None, CT, Lb), lambda b, c: (b, c, 0)),
            # halo: first Lh samples of the *next* chunk.
            pl.BlockSpec((None, CT, Lh), lambda b, c: (b, c, 0)),
            # resident banded weights (constant index_map -> loaded once).
            pl.BlockSpec((Lb, N_pad), lambda b, c: (0, 0)),
            pl.BlockSpec((Lh, N_pad), lambda b, c: (0, 0)),
        ],
        out_specs=pl.BlockSpec((None, CT, N_pad), lambda b, c: (b, c, 0)),
        compiler_params=pltpu.CompilerParams(
            # Independent (batch, chunk-block) tiles: shard across v7x's 2 TCs.
            dimension_semantics=("parallel", "parallel"),
            # Actual use is <~20 MiB even at CT=2048 bf16; 48 MiB is safe on
            # v5e/v6e (128 MiB) and within v7x's 64 MiB physical VMEM.
            vmem_limit_bytes=48 * 1024 * 1024,
        ),
    )(xp3, halo3, wb, wh)


# ----------------------------------------------------------------------------
# Forward pass (matches ResampleFrac.forward semantics)
# ----------------------------------------------------------------------------
def resample_frac(x, old_sr: int, new_sr: int, zeros: int = 24,
                  rolloff: float = 0.945,
                  output_length: Optional[int] = None, full: bool = False):
    kernel_np, width, old, new = build_resample_filter(old_sr, new_sr, zeros, rolloff)
    if old == new:
        return x

    shape = x.shape
    length = shape[-1]
    B = 1
    for s in shape[:-1]:
        B *= s
    B = max(B, 1)

    wb_np, wh_np, G, N, N_pad, Lb, halo, Lh = _build_banded_weights(
        kernel_np, width, old, new)

    num_frames = length // old + 1
    n_chunks = -(-num_frames // G)

    # Chunk-row tiling: multiple of 16 (bf16 sublane packing), large enough to
    # amortize the ~0.35us/grid-step cost, capped so the per-step VMEM stays
    # modest, and with enough grid steps (>=~4) for the v7x 2-TC split.
    np16 = _round_up(max(n_chunks, 1), 16)
    max_ct = min(2048, max(64, ((4 * 1024 * 1024) // max(Lb * 2, 1)) // 16 * 16))
    nblk_bw = -(-np16 // max_ct)
    nblk_par = min(max(1, -(-4 // B)), max(1, np16 // 16))
    nblk = max(nblk_bw, nblk_par)
    CT = _round_up(-(-np16 // nblk), 16)
    n_chunks_pad = nblk * CT

    # Single replicate pad covers the module's (width, width+old) pad AND the
    # extension to the chunk grid (+1 halo chunk); extra samples only feed
    # frames that the output-length slice discards.  Cast to bf16 for the MXU.
    x2 = jnp.reshape(x, (B, length)).astype(jnp.bfloat16)
    l_ext = (n_chunks_pad + 1) * Lb
    xp = jnp.pad(x2, ((0, 0), (width, l_ext - width - length)), mode="edge")
    xp3 = xp.reshape(B, n_chunks_pad + 1, Lb)      # zero-copy body operand
    halo3 = xp3[:, 1:, :Lh]                        # contiguous slice, no gather

    out_dtype = jnp.bfloat16 if x.dtype == jnp.bfloat16 else jnp.float32
    wb = jnp.asarray(wb_np, dtype=jnp.bfloat16)
    wh = jnp.asarray(wh_np, dtype=jnp.bfloat16)

    out = _banded_matmul(xp3, halo3, wb, wh, CT, nblk, out_dtype)
    # out: [B, n_chunks_pad, N_pad]; :N is a no-op when the 128-snap applied.
    y = out[:, :n_chunks, :N].reshape(B, n_chunks * N)
    y = y.reshape(list(shape[:-1]) + [n_chunks * N])

    # output-length logic (static, since JAX shapes are static)
    float_output_length = new * length / old
    max_output_length = math.ceil(float_output_length)
    default_output_length = math.floor(float_output_length)
    if output_length is None:
        applied = max_output_length if full else default_output_length
    elif output_length < 0 or output_length > max_output_length:
        raise ValueError(f"output_length must be between 0 and {max_output_length}")
    else:
        if full:
            raise ValueError("You cannot pass both full=True and output_length")
        applied = output_length
    return y[..., :applied].astype(x.dtype)


# ----------------------------------------------------------------------------
# Reference (independent): XLA strided conv, same math as torch F.conv1d
# ----------------------------------------------------------------------------
def _reference_resample(x, old_sr, new_sr, zeros=24, rolloff=0.945):
    kernel_np, width, old, new = build_resample_filter(old_sr, new_sr, zeros, rolloff)
    if old == new:
        return x
    shape = x.shape
    length = shape[-1]
    x2 = x.reshape(-1, length).astype(jnp.float32)
    xp = jnp.pad(x2, ((0, 0), (width, width + old)), mode="edge")
    kernel = jnp.asarray(kernel_np)
    ys = jax.lax.conv_general_dilated(
        xp[:, None, :], kernel[:, None, :],
        window_strides=(old,), padding="VALID",
        dimension_numbers=("NCH", "OIH", "NCH"),
        precision=jax.lax.Precision.HIGHEST)                   # [B, new, F]
    y = jnp.transpose(ys, (0, 2, 1)).reshape(list(shape[:-1]) + [-1])
    return y[..., :math.floor(new * length / old)]


if __name__ == "__main__":
    old_sr, new_sr = 4, 5          # GCD-reduced; width=26, K=56 for zeros=24
    key = jax.random.PRNGKey(0)

    # Case 1: batched [*, T]
    x = jax.random.normal(key, (2, 4, 64), dtype=jnp.float32)
    y = jax.block_until_ready(resample_frac(x, old_sr, new_sr))
    expected_len = int(new_sr * x.shape[-1] / old_sr)
    assert y.shape == (2, 4, expected_len), y.shape
    y_ref = jax.block_until_ready(_reference_resample(x, old_sr, new_sr))
    err = float(jnp.max(jnp.abs(y - y_ref)))
    # bf16 operands/weights (per perf guidance, f32 accumulation) vs a float32
    # HIGHEST-precision reference; typical error ~3e-3, tolerance covers the
    # bf16 operand-rounding tail.  Indexing/weight bugs would be O(0.1-1).
    assert jnp.allclose(y, y_ref, atol=1e-2, rtol=1e-2), err

    # Case 2: 1-D signal long enough to span multiple chunks (exercises the
    # cross-chunk halo path); doc example: ResampleFrac(4, 5) on 1000 samples.
    x1 = jax.random.normal(jax.random.PRNGKey(1), (1000,), dtype=jnp.float32)
    y1 = jax.block_until_ready(resample_frac(x1, old_sr, new_sr))
    assert y1.shape == (1250,), y1.shape
    y1_ref = jax.block_until_ready(_reference_resample(x1, old_sr, new_sr))
    err1 = float(jnp.max(jnp.abs(y1 - y1_ref)))
    assert jnp.allclose(y1, y1_ref, atol=1e-2, rtol=1e-2), err1

    print("KERNEL_OK")
</pallas_src>

<mosaic_0001>
module attributes {stable_mosaic.version = 11 : i64} {
  func.func @_banded_mm_kernel(%arg0: i32, %arg1: i32, %arg2: memref<1x16x512xbf16, #tpu.memory_space<vmem>>, %arg3: memref<1x16x128xbf16, #tpu.memory_space<vmem>>, %arg4: memref<512x640xbf16, #tpu.memory_space<vmem>>, %arg5: memref<128x640xbf16, #tpu.memory_space<vmem>>, %arg6: memref<1x16x640xf32, #tpu.memory_space<vmem>>) attributes {dimension_semantics = [#tpu.dimension_semantics<parallel>, #tpu.dimension_semantics<parallel>], iteration_bounds = array<i64: 8, 1>, scalar_prefetch = 0 : i64, scratch_operands = 0 : i64, tpu.core_type = #tpu.core_type<tc>, window_params = [{transform_indices = @transform_0, window_bounds = array<i64: 1, 16, 512>}, {transform_indices = @transform_1, window_bounds = array<i64: 1, 16, 128>}, {pipeline_mode = #tpu.pipeline_mode<synchronous>, transform_indices = @transform_2, window_bounds = array<i64: 512, 640>}, {pipeline_mode = #tpu.pipeline_mode<synchronous>, transform_indices = @transform_3, window_bounds = array<i64: 128, 640>}, {transform_indices = @transform_4, window_bounds = array<i64: 1, 16, 640>}]} {
    %c0 = arith.constant 0 : index
    %c0_0 = arith.constant 0 : index
    %c0_1 = arith.constant 0 : index
    %0 = vector.load %arg2[%c0, %c0_0, %c0_1] : memref<1x16x512xbf16, #tpu.memory_space<vmem>>, vector<1x16x512xbf16>
    %1 = vector.shape_cast %0 : vector<1x16x512xbf16> to vector<16x512xbf16>
    %c0_2 = arith.constant 0 : index
    %c0_3 = arith.constant 0 : index
    %2 = vector.load %arg4[%c0_2, %c0_3] : memref<512x640xbf16, #tpu.memory_space<vmem>>, vector<512x640xbf16>
    %cst = arith.constant dense<0.000000e+00> : vector<16x640xf32>
    %3 = tpu.matmul %1, %2, %cst {dimension_numbers = #tpu.dot_dimension_numbers<[1], [0], [0], [1], [0, 0, 1, 1], [], []>} : vector<16x512xbf16>, vector<512x640xbf16>, vector<16x640xf32> -> vector<16x640xf32>
    %c0_4 = arith.constant 0 : index
    %c0_5 = arith.constant 0 : index
    %c0_6 = arith.constant 0 : index
    %4 = vector.load %arg3[%c0_4, %c0_5, %c0_6] : memref<1x16x128xbf16, #tpu.memory_space<vmem>>, vector<1x16x128xbf16>
    %5 = vector.shape_cast %4 : vector<1x16x128xbf16> to vector<16x128xbf16>
    %c0_7 = arith.constant 0 : index
    %c0_8 = arith.constant 0 : index
    %6 = vector.load %arg5[%c0_7, %c0_8] : memref<128x640xbf16, #tpu.memory_space<vmem>>, vector<128x640xbf16>
    %cst_9 = arith.constant dense<0.000000e+00> : vector<16x640xf32>
    %7 = tpu.matmul %5, %6, %cst_9 {dimension_numbers = #tpu.dot_dimension_numbers<[1], [0], [0], [1], [0, 0, 1, 1], [], []>} : vector<16x128xbf16>, vector<128x640xbf16>, vector<16x640xf32> -> vector<16x640xf32>
    %8 = arith.addf %3, %7 : vector<16x640xf32>
    %c0_10 = arith.constant 0 : index
    %c0_11 = arith.constant 0 : index
    %c0_12 = arith.constant 0 : index
    %9 = vector.load %arg6[%c0_10, %c0_11, %c0_12] : memref<1x16x640xf32, #tpu.memory_space<vmem>>, vector<1x16x640xf32>
    %10 = vector.shape_cast %9 : vector<1x16x640xf32> to vector<16x640xf32>
    %11 = vector.shape_cast %8 : vector<16x640xf32> to vector<1x16x640xf32>
    tpu.vector_store %arg6[%c0_10, %c0_11, %c0_12], %11 {strides = array<i32>} : memref<1x16x640xf32, #tpu.memory_space<vmem>>, vector<1x16x640xf32>,
    return
  }
  func.func @transform_0(%arg0: i32, %arg1: i32) -> (i32, i32, i32) {
    %c0_i32 = arith.constant 0 : i32
    %c0_i32_0 = arith.constant 0 : i32
    return %arg0, %arg1, %c0_i32 : i32, i32, i32
  }
  func.func @transform_1(%arg0: i32, %arg1: i32) -> (i32, i32, i32) {
    %c0_i32 = arith.constant 0 : i32
    %c0_i32_0 = arith.constant 0 : i32
    return %arg0, %arg1, %c0_i32 : i32, i32, i32
  }
  func.func @transform_2(%arg0: i32, %arg1: i32) -> (i32, i32) {
    %c0_i32 = arith.constant 0 : i32
    %c0_i32_0 = arith.constant 0 : i32
    %c0_i32_1 = arith.constant 0 : i32
    return %c0_i32, %c0_i32_0 : i32, i32
  }
  func.func @transform_3(%arg0: i32, %arg1: i32) -> (i32, i32) {
    %c0_i32 = arith.constant 0 : i32
    %c0_i32_0 = arith.constant 0 : i32
    %c0_i32_1 = arith.constant 0 : i32
    return %c0_i32, %c0_i32_0 : i32, i32
  }
  func.func @transform_4(%arg0: i32, %arg1: i32) -> (i32, i32, i32) {
    %c0_i32 = arith.constant 0 : i32
    %c0_i32_0 = arith.constant 0 : i32
    return %arg0, %arg1, %c0_i32 : i32, i32, i32
  }
}

</mosaic_0001>

<bundles_post_ra>
// kernel: tpu_custom_call.1
= control target key start
LH: loop header
LB: loop body
LE: loop exit
PB: predicated region body
PF: predicated region fallthrough
CT: control target
= control target key end

     0   :  { %9 = vsyncpa [#allocation3], 0  ;;  %s3249_s0 = inlined_call_operand.vmem [shape: bf16[8,17,512], index: 0, kind: input, shape index: {}]   ;;  %s3250_s1 = inlined_call_operand.vmem [shape: bf16[8,16,128], index: 1, kind: input, shape index: {}]   ;;  %s3251_s2 = inlined_call_operand.hbm [shape: bf16[512,640], index: 2, kind: input, shape index: {}]   ;;  %s3252_s3 = inlined_call_operand.vmem [shape: bf16[128,640], index: 3, kind: input, shape index: {}]   ;;  %s3253_s4 = inlined_call_operand.hbm [shape: f32[8,16,640], index: 4, kind: output, shape index: {}]  }
   0x1   :  { %10 = vsyncpa [#allocation4], 0 }
   0x2   :  { %12 = vsyncpa [#allocation4 + $0x1], 0  ;;  %s2936_s15 = smov 0   ;;  %s2938_s16 = smov 0  }
   0x3   :  { %s2940_s17 = smov 0   ;;  %s2942_s18 = smov 0  }
   0x4   :  { %s2944_s19 = smov 0   ;;  %s2946_s20 = smov 0  }
   0x5 LB: > { %s2139_s21 = sadd.s32 4294967295, %s2900_s20   ;;  %s2140_s22 = sadd.s32 4294967294, %s2900_s20   ;;  %s2900_s20 = sphi %s2946_s20, %s18_s20   ;;  %s2896_s19 = sphi %s2944_s19, %s3262_s19   ;;  %s2892_s18 = sphi %s2942_s18, %s3261_s18   ;;  %s2888_s17 = sphi %s2940_s17, %s3260_s17   ;;  %s2884_s16 = sphi %s2938_s16, %s3259_s16   ;;  %s2880_s15 = sphi %s2936_s15, %s3258_s15  }
   0x6   : > { %s30_s23 = sadd.s32 1, %s2896_s19  ;;  %s137_s24 = sadd.s32 1, %s2888_s17 }
   0x7   : > { %p32_p0 = scmp.ge.s32.totalorder %s30_s23, 8  ;;  %p147_p1 = scmp.ne.s32.totalorder %s2888_s17, %s2884_s16 }
   0x8   : > { %p148_p2 = scmp.eq.s32.totalorder %s2139_s21, 7  ;;  %p153_p3 = scmp.ne.s32.totalorder %s2884_s16, %s2880_s15 }
   0x9   : > { %s3264_s23 = smov (%p32_p0, %s30_s23), 0  ;;  %p154_p5 = scmp.eq.s32.totalorder %s2140_s22, 7 }
   0xa   : > { %p2976_p4 = por %p148_p2, %p147_p1  ;;  %s132_s26 = ssub.s32 %s2896_s19, %s3264_s23 }
   0xb   : > { %p2141_p6 = scmp.ge.s32.totalorder %s2900_s20, 1  ;;  %p135_p7 = scmp.eq.s32.totalorder %s132_s26, 0 }
   0xc   : > { %p2983_p8 = por %p154_p5, %p153_p3  ;;  %p161_p9 = scmp.lt.s32.totalorder %s2900_s20, 9 }
   0xd   : > { %s2989_s28 = scalar_select %p135_p7, %s2888_s17, %s137_s24  }
   0xe   : > { %p2991_p10 = pnand %p2141_p6, %p161_p9  ;;  %p2995_p11 = scmp.eq.s32.totalorder %s2139_s21, 0 }
   0xf   : > { %s2902_s5 = smov [#allocation2]  }
  0x10   : > { %p2440_p12 = pneg %p2991_p10  ;;  %s173_s6 = sshll.u32 %s2902_s5, 4  ;;  %s174_s6 = int_to_ptr.vmem [resolvable:$true] %s173_s6 }
  0x11   : > { %s2805_s7 = scalar_lea.vmem %s174_s6, 20480  ;;  %p2813_p5 = scmp.lt.s32.totalorder %s174_s6, %s174_s6 }
  0x12   : > { %p2441_p13 = pnand %p2995_p11, %p2440_p12  ;;  %p2806_p1 = scmp.ne.s32.totalorder %s174_s6, %s2805_s7 }
  0x13   : > { %p2814_p6 = scmp.lt.s32.totalorder %s2805_s7, %s2805_s7 }
  0x14   : > { %p2796_p0 = pneg %p2441_p13 }
  0x15   : > { %p2815_p7 = por %p2814_p6, %p2813_p5 }
  0x16   : > { %p2808_p2 = pnand %p2806_p1, %p2796_p0 }
  0x18   : > { %p2809_p3 = pneg %p2808_p2 }
  0x1a   : > { %p2816_p9 = pnand %p2815_p7, %p2809_p3 }
  0x1c   : > { %2819 = shalt.err (!%p2816_p9)
}
  0x1d   : > { %s2903_s8 = smov 320   ;;  %s2904_s9 = smov 20  }
  0x1e   : > { %2443 = dma.hbm_to_vmem [thread:$0]  (!%p2441_p13), %s3251_s2, 20480, %s174_s6, [#allocation3], %s2903_s8, %s2903_s8, %s2904_s9  }
  0x1f   : > { %229 = sbr.rel (%p2991_p10) target bundleno = 480 (0x1e0), region = 36 }
  0x24   : > { %2871 = dma.done.wait (%p2995_p11), [#allocation3], 20480  }
  0x25   : > { %2873 = vsyncadd (%p2995_p11), [#allocation3], 4294946816  ;;  %v2905_v0 = vmov 0   ;;  %v2507_v1 = vld [vmem:[%s3252_s3 + $0x11c] ss:$20 sps:$4 sm:$0xff]   ;;  %p280_p10 = scmp.lt.s32.totalorder %s2892_s18, 7 }
  0x26   : > { %799 = vmatprep.mubr.bf16.mxu0 %v2905_v0  ;;  %842 = vmatprep.mubr.bf16.mxu1 %v2905_v0  ;;  %v2509_v2 = vld [vmem:[%s3252_s3 + $0x124] ss:$20 sps:$4 sm:$0xff]   ;;  %v2512_v4 = vld [vmem:[%s3252_s3 + $0x120] ss:$20 sps:$4 sm:$0xff]   ;;  %v2515_v6 = vld [vmem:[%s3252_s3 + $0xfc] ss:$20 sps:$4 sm:$0xff]  }
  0x27   : > { %767 = vmatprep.subr.bf16.mxu0 %v2507_v1  ;;  %v2511_v3 = vld [vmem:[%s3252_s3 + $0x118] ss:$20 sps:$4 sm:$0xff]   ;;  %810 = vmatprep.subr.bf16.mxu1 %v2509_v2  ;;  %v2513_v5 = vld [vmem:[%s3252_s3 + $0xf4] ss:$20 sps:$4 sm:$0xff]   ;;  %v2517_v7 = vld [vmem:[%s3252_s3 + $0xf0] ss:$20 sps:$4 sm:$0xff]  }
  0x28   : > { %768 = vmatpush1.bf16.msra.mxu0 %v2511_v3  ;;  %811 = vmatpush1.bf16.msra.mxu1 %v2512_v4  ;;  %v2518_v8 = vld [vmem:[%s3252_s3 + $0xf8] ss:$20 sps:$4 sm:$0xff]   ;;  %v2521_v10 = vld [vmem:[%s3252_s3 + $0xd4] ss:$20 sps:$4 sm:$0xff]   ;;  %v2524_v12 = vld [vmem:[%s3252_s3 + $0xd0] ss:$20 sps:$4 sm:$0xff]  }
  0x29   : > { %769 = vmatprep.subr.bf16.mxu0 %v2513_v5  ;;  %812 = vmatprep.subr.bf16.mxu1 %v2515_v6  ;;  %v2519_v9 = vld [vmem:[%s3252_s3 + $0xcc] ss:$20 sps:$4 sm:$0xff]   ;;  %v2523_v11 = vld [vmem:[%s3252_s3 + $0xc8] ss:$20 sps:$4 sm:$0xff]   ;;  %v2525_v13 = vld [vmem:[%s3252_s3 + $0xa4] ss:$20 sps:$4 sm:$0xff]  }
  0x2a   : > { %v2527_v14 = vld [vmem:[%s3252_s3 + $0xac] ss:$20 sps:$4 sm:$0xff]   ;;  %v2530_v16 = vld [vmem:[%s3252_s3 + $0xa8] ss:$20 sps:$4 sm:$0xff]   ;;  %v2533_v18 = vld [vmem:[%s3252_s3 + $0x84] ss:$20 sps:$4 sm:$0xff]  }
  0x2b   : > { %v2529_v15 = vld [vmem:[%s3252_s3 + $0xa0] ss:$20 sps:$4 sm:$0xff]   ;;  %v2531_v17 = vld [vmem:[%s3252_s3 + $0x7c] ss:$20 sps:$4 sm:$0xff]   ;;  %s3068_s22 = scalar_select %p280_p10, %s2892_s18, 7  ;;  %v2906_v37 = vmov 0.0  }
  0x2c   : > { %770 = vmatpush1.bf16.msra.mxu0 %v2517_v7  ;;  %813 = vmatpush1.bf16.msra.mxu1 %v2518_v8  ;;  %v2535_v19 = vld [vmem:[%s3252_s3 + $0x78] ss:$20 sps:$4 sm:$0xff]   ;;  %v2536_v20 = vld [vmem:[%s3252_s3 + $0x80] ss:$20 sps:$4 sm:$0xff]   ;;  %v2539_v22 = vld [vmem:[%s3252_s3 + $0x5c] ss:$20 sps:$4 sm:$0xff]  }
  0x2d   : > { %771 = vmatprep.subr.bf16.mxu0 %v2519_v9  ;;  %814 = vmatprep.subr.bf16.mxu1 %v2521_v10  ;;  %v2537_v21 = vld [vmem:[%s3252_s3 + $0x54] ss:$20 sps:$4 sm:$0xff]   ;;  %s2357_s9 = sshll.u32 %s3068_s22, 3  ;;  %v2541_v23 = vld [vmem:[%s3252_s3 + $0x50] ss:$20 sps:$4 sm:$0xff]   ;;  %vm2907_vm0 = vmmov 0  }
  0x2e   : > { %v2542_v24 = vld [vmem:[%s3252_s3 + $0x58] ss:$20 sps:$4 sm:$0xff]   ;;  %s303_s29 = scalar_lea.vmem %s3250_s1, %s2357_s9  ;;  %v2545_v26 = vld [vmem:[%s3252_s3 + $0x34] ss:$20 sps:$4 sm:$0xff]   ;;  %v2548_v28 = vld [vmem:[%s3252_s3 + $0x30] ss:$20 sps:$4 sm:$0xff]  }
  0x2f   : > { %v2543_v25 = vld [vmem:[%s3252_s3 + $0x2c] ss:$20 sps:$4 sm:$0xff]   ;;  %v2547_v27 = vld [vmem:[%s3252_s3 + $0x28] ss:$20 sps:$4 sm:$0xff]   ;;  %v2549_v29 = vld [vmem:[%s3252_s3 + $0x4] ss:$20 sps:$4 sm:$0xff]  }
  0x30   : > { %772 = vmatpush1.bf16.msra.mxu0 %v2523_v11  ;;  %815 = vmatpush1.bf16.msra.mxu1 %v2524_v12  ;;  %v2551_v30 = vld [vmem:[%s3252_s3 + $0xc] ss:$20 sps:$4 sm:$0xff]   ;;  %v2554_v32 = vld [vmem:[%s3252_s3 + $0x8] ss:$20 sps:$4 sm:$0xff]   ;;  %v2560_v39 = vld [vmem:[#allocation2 + $0xf0] ss:$20 sps:$4 sm:$0xff]  }
  0x31   : > { %773 = vmatprep.subr.bf16.mxu0 %v2525_v13  ;;  %816 = vmatprep.subr.bf16.mxu1 %v2527_v14  ;;  %v2553_v31 = vld [vmem:[%s3252_s3] ss:$20 sps:$4 sm:$0xff]   ;;  %v2558_v33 = vld [vmem:[#allocation2 + $0x11c] ss:$20 sps:$4 sm:$0xff]   ;;  %v2556_v35 = vld [vmem:[#allocation2 + $0x118] ss:$20 sps:$4 sm:$0xff]  }
  0x32   : > { %v3116_v34 = vld [vmem:[%s303_s29] sm:$0xff]   ;;  %v2559_v36 = vld [vmem:[%s3252_s3 + $0x128] ss:$20 sps:$4 sm:$0xff]   ;;  %v2567_v43 = vld [vmem:[%s3252_s3 + $0xd8] ss:$20 sps:$4 sm:$0xff]   ;;  %s2432_s26 = smul.u32 48, %s3068_s22 }
  0x33   : > { %v2562_v38 = vld [vmem:[#allocation2 + $0xf4] ss:$20 sps:$4 sm:$0xff]   ;;  %v2566_v41 = vld [vmem:[#allocation2 + $0xcc] ss:$20 sps:$4 sm:$0xff]   ;;  %v2570_v44 = vld [vmem:[#allocation2 + $0xa4] ss:$20 sps:$4 sm:$0xff]  }
  0x34   : > { %774 = vmatpush1.bf16.msra.mxu0 %v2529_v15  ;;  %817 = vmatpush1.bf16.msra.mxu1 %v2530_v16  ;;  %v2563_v40 = vld [vmem:[%s3252_s3 + $0x100] ss:$20 sps:$4 sm:$0xff]   ;;  %v2564_v42 = vld [vmem:[#allocation2 + $0xc8] ss:$20 sps:$4 sm:$0xff]   ;;  %v2571_v46 = vld [vmem:[%s3252_s3 + $0xb0] ss:$20 sps:$4 sm:$0xff]   ;;  %s3148_s7 = scalar_lea.vmem %s3249_s0, %s2432_s26 }
  0x35   : > { %775 = vmatprep.subr.bf16.mxu0 %v2531_v17  ;;  %818 = vmatprep.subr.bf16.mxu1 %v2533_v18  ;;  %v2568_v45 = vld [vmem:[#allocation2 + $0xa0] ss:$20 sps:$4 sm:$0xff]   ;;  %v2574_v47 = vld [vmem:[#allocation2 + $0x7c] ss:$20 sps:$4 sm:$0xff]   ;;  %v2572_v48 = vld [vmem:[#allocation2 + $0x78] ss:$20 sps:$4 sm:$0xff]  }
  0x36   : > { %v2575_v49 = vld [vmem:[%s3252_s3 + $0x88] ss:$20 sps:$4 sm:$0xff]   ;;  %v2576_v51 = vld [vmem:[#allocation2 + $0x50] ss:$20 sps:$4 sm:$0xff]   ;;  %v2579_v52 = vld [vmem:[%s3252_s3 + $0x60] ss:$20 sps:$4 sm:$0xff]  }
  0x37   : > { %v2578_v50 = vld [vmem:[#allocation2 + $0x54] ss:$20 sps:$4 sm:$0xff]   ;;  %v2582_v53 = vld [vmem:[#allocation2 + $0x2c] ss:$20 sps:$4 sm:$0xff]   ;;  %v2586_v56 = vld [vmem:[#allocation2 + $0x4] ss:$20 sps:$4 sm:$0xff]  }
  0x38   : > { %776 = vmatpush1.bf16.msra.mxu0 %v2535_v19  ;;  %819 = vmatpush1.bf16.msra.mxu1 %v2536_v20  ;;  %v2580_v54 = vld [vmem:[#allocation2 + $0x28] ss:$20 sps:$4 sm:$0xff]   ;;  %v2583_v55 = vld [vmem:[%s3252_s3 + $0x38] ss:$20 sps:$4 sm:$0xff]   ;;  %v2584_v57 = vld [vmem:[#allocation2] ss:$20 sps:$4 sm:$0xff]  }
  0x39   : > { %777 = vmatprep.subr.bf16.mxu0 %v2537_v21  ;;  %820 = vmatprep.subr.bf16.mxu1 %v2539_v22  ;;  %v2587_v58 = vld [vmem:[%s3252_s3 + $0x10] ss:$20 sps:$4 sm:$0xff]   ;;  %v2588_v61 = vld [vmem:[#allocation2 + $0x258] ss:$20 sps:$4 sm:$0xff]   ;;  %v2596_v0 = vld [vmem:[#allocation2 + $0x234] ss:$20 sps:$4 sm:$0xff]  }
  0x3a   : > { %v2590_v59 = vld [vmem:[#allocation2 + $0x25c] ss:$20 sps:$4 sm:$0xff]   ;;  %v3151_v62 = vld [vmem:[%s3148_s7 + $0x4] ss:$16 sps:$4 sm:$0xff]   ;;  %v2591_v63 = vld [vmem:[#allocation2 + $0x398] ss:$20 sps:$4 sm:$0xff]  }
  0x3b   : > { %v2593_v60 = vld [vmem:[#allocation2 + $0x39c] ss:$20 sps:$4 sm:$0xff]   ;;  %v2599_v1 = vld [vmem:[#allocation2 + $0x374] ss:$20 sps:$4 sm:$0xff]   ;;  %v2602_v4 = vld [vmem:[#allocation2 + $0x20c] ss:$20 sps:$4 sm:$0xff]  }
  0x3c   : > { %778 = vmatpush1.bf16.msra.mxu0 %v2541_v23  ;;  %821 = vmatpush1.bf16.msra.mxu1 %v2542_v24  ;;  %v2594_v2 = vld [vmem:[#allocation2 + $0x230] ss:$20 sps:$4 sm:$0xff]   ;;  %v2605_v5 = vld [vmem:[#allocation2 + $0x34c] ss:$20 sps:$4 sm:$0xff]   ;;  %v2600_v6 = vld [vmem:[#allocation2 + $0x208] ss:$20 sps:$4 sm:$0xff]  }
  0x3d   : > { %779 = vmatprep.subr.bf16.mxu0 %v2543_v25  ;;  %822 = vmatprep.subr.bf16.mxu1 %v2545_v26  ;;  %v2597_v3 = vld [vmem:[#allocation2 + $0x370] ss:$20 sps:$4 sm:$0xff]   ;;  %v2603_v7 = vld [vmem:[#allocation2 + $0x348] ss:$20 sps:$4 sm:$0xff]   ;;  %v2606_v10 = vld [vmem:[#allocation2 + $0x1e0] ss:$20 sps:$4 sm:$0xff]  }
  0x3e   : > { %v2608_v8 = vld [vmem:[#allocation2 + $0x1e4] ss:$20 sps:$4 sm:$0xff]   ;;  %v2609_v11 = vld [vmem:[#allocation2 + $0x320] ss:$20 sps:$4 sm:$0xff]   ;;  %v2614_v12 = vld [vmem:[#allocation2 + $0x1bc] ss:$20 sps:$4 sm:$0xff]  }
  0x3f   : > { %v2611_v9 = vld [vmem:[#allocation2 + $0x324] ss:$20 sps:$4 sm:$0xff]   ;;  %v2617_v13 = vld [vmem:[#allocation2 + $0x2fc] ss:$20 sps:$4 sm:$0xff]   ;;  %v2620_v16 = vld [vmem:[#allocation2 + $0x194] ss:$20 sps:$4 sm:$0xff]  }
  0x40   : > { %780 = vmatpush1.bf16.msra.mxu0 %v2547_v27  ;;  %823 = vmatpush1.bf16.msra.mxu1 %v2548_v28  ;;  %v2612_v14 = vld [vmem:[#allocation2 + $0x1b8] ss:$20 sps:$4 sm:$0xff]   ;;  %v2623_v17 = vld [vmem:[#allocation2 + $0x2d4] ss:$20 sps:$4 sm:$0xff]   ;;  %v2618_v18 = vld [vmem:[#allocation2 + $0x190] ss:$20 sps:$4 sm:$0xff]  }
  0x41   : > { %781 = vmatprep.subr.bf16.mxu0 %v2549_v29  ;;  %824 = vmatprep.subr.bf16.mxu1 %v2551_v30  ;;  %v2615_v15 = vld [vmem:[#allocation2 + $0x2f8] ss:$20 sps:$4 sm:$0xff]   ;;  %v2621_v19 = vld [vmem:[#allocation2 + $0x2d0] ss:$20 sps:$4 sm:$0xff]   ;;  %v2624_v23 = vld [vmem:[#allocation2 + $0x168] ss:$20 sps:$4 sm:$0xff]  }
  0x42   : > { %v2626_v20 = vld [vmem:[#allocation2 + $0x16c] ss:$20 sps:$4 sm:$0xff]   ;;  %v2627_v24 = vld [vmem:[#allocation2 + $0x2a8] ss:$20 sps:$4 sm:$0xff]   ;;  %v2632_v25 = vld [vmem:[#allocation2 + $0x144] ss:$20 sps:$4 sm:$0xff]  }
  0x43   : > { %v2629_v21 = vld [vmem:[#allocation2 + $0x2ac] ss:$20 sps:$4 sm:$0xff]   ;;  %v2635_v26 = vld [vmem:[#allocation2 + $0x284] ss:$20 sps:$4 sm:$0xff]   ;;  %v2641_v29 = vld [vmem:[#allocation2 + $0x4dc] ss:$20 sps:$4 sm:$0xff]  }
  0x44   : > { %782 = vmatpush1.bf16.msra.mxu0 %v2553_v31  ;;  %825 = vmatpush1.bf16.msra.mxu1 %v2554_v32  ;;  %v3156_v22 = vld [vmem:[%s3148_s7 + $0xc] ss:$16 sps:$4 sm:$0xff]   ;;  %v2630_v27 = vld [vmem:[#allocation2 + $0x140] ss:$20 sps:$4 sm:$0xff]   ;;  %v2644_v30 = vld [vmem:[#allocation2 + $0x124] ss:$20 sps:$4 sm:$0xff]  }
  0x45   : > { %2411 = vmatprep.subr.bf16.mxu0 %v2906_v37  ;;  %1746 = vmatprep.subr.bf16.mxu1 %v2558_v33  ;;  %v2633_v28 = vld [vmem:[#allocation2 + $0x280] ss:$20 sps:$4 sm:$0xff]   ;;  %v2639_v32 = vld [vmem:[#allocation2 + $0x4d8] ss:$20 sps:$4 sm:$0xff]   ;;  %s271_s22 = sand.u32 1, %s2884_s16   ;;  %s2433_s11 = smul.u32 1280, %s2892_s18 }
  0x46   : > { %v3160_v31 = vld [vmem:[%s3148_s7] ss:$16 sps:$4 sm:$0xff]   ;;  %s2431_s8 = smul.u32 80, %s271_s22  ;;  %s3204_s18 = scalar_lea.sflag [#allocation4], %s271_s22 }
  0x47   : > { %800 = vmatmul.mubr.bf16.vlgmr.msra.gmra.mxu0 %v3116_v34  ;;  %843 = vmatmul.mubr.bf16.vlgmr.msra.gmra.mxu1 %v3116_v34  ;;  %v2642_v33 = vld [vmem:[#allocation2 + $0x120] ss:$20 sps:$4 sm:$0xff]   ;;  %s3197_s14 = scalar_lea.hbm %s3253_s4, %s2433_s11  ;;  %s2908_s24 = smov [#allocation5]  }
  0x48   : > { %2412 = vmatpush3.bf16.msra.mxu0 %v2559_v36  ;;  %1747 = vmatpush1.bf16.msra.mxu1 %v2556_v35  ;;  %v2650_v35 = vld [vmem:[#allocation2 + $0xfc] ss:$20 sps:$4 sm:$0xff]   ;;  %s3180_s10 = scalar_lea.vmem [#allocation5], %s2431_s8  ;;  %s2824_s26 = sshll.u32 %s2908_s24, 4  ;;  %s2825_s26 = int_to_ptr.vmem [resolvable:$false] %s2824_s26 }
  0x49   : > { %2413 = vmatprep.subr.bf16.mxu0 %v2906_v37  ;;  %1748 = vmatprep.subr.bf16.mxu1 %v2562_v38  ;;  %v2645_v36 = vld [vmem:[#allocation2 + $0x4b0] ss:$20 sps:$4 sm:$0xff]   ;;  %v2653_v38 = vld [vmem:[#allocation2 + $0x48c] ss:$20 sps:$4 sm:$0xff]   ;;  %s2027_s9 = sshll.u32 %s3180_s10, 4  ;;  %s2826_s30 = scalar_lea.vmem %s2825_s26, 2560  ;;  %s3199_s9 = int_to_ptr.vmem [resolvable:$true] %s2027_s9 }
  0x4a   : > { %2427 = vmatprep.mubr.msk.bf16.mxu0 %vm2907_vm0, %v2906_v37  ;;  %1778 = vmatprep.mubr.bf16.mxu1 %v3151_v62  ;;  %s2820_s21 = scalar_lea.vmem %s3199_s9, 1280  ;;  %p2827_p0 = scmp.lt.s32.totalorder %s3199_s9, %s2825_s26 }
  0x4b   : > { %p2821_p11 = scmp.ne.s32.totalorder %s3199_s9, %s2820_s21  ;;  %p2828_p1 = scmp.lt.s32.totalorder %s2826_s30, %s2820_s21 }
  0x4c   : > { %2414 = vmatpush3.bf16.msra.mxu0 %v2563_v40  ;;  %1749 = vmatpush1.bf16.msra.mxu1 %v2560_v39  ;;  %v2656_v39 = vld [vmem:[#allocation2 + $0xd4] ss:$20 sps:$4 sm:$0xff]  }
  0x4d   : > { %2415 = vmatprep.subr.bf16.mxu0 %v2906_v37  ;;  %1750 = vmatprep.subr.bf16.mxu1 %v2566_v41  ;;  %v2651_v40 = vld [vmem:[#allocation2 + $0x488] ss:$20 sps:$4 sm:$0xff]   ;;  %v2654_v41 = vld [vmem:[#allocation2 + $0xd0] ss:$20 sps:$4 sm:$0xff]   ;;  %p2822_p12 = pnand %p2821_p11, %p2976_p4  ;;  %p2829_p2 = por %p2828_p1, %p2827_p0 }
  0x4f   : > { %p2823_p13 = pneg %p2822_p12 }
  0x50   : > { %2416 = vmatpush3.bf16.msra.mxu0 %v2567_v43  ;;  %1751 = vmatpush1.bf16.msra.mxu1 %v2564_v42  ;;  %v2659_v42 = vld [vmem:[#allocation2 + $0x464] ss:$20 sps:$4 sm:$0xff]   ;;  %v2662_v43 = vld [vmem:[#allocation2 + $0xac] ss:$20 sps:$4 sm:$0xff]  }
  0x51   : > { %2417 = vmatprep.subr.bf16.mxu0 %v2906_v37  ;;  %1752 = vmatprep.subr.bf16.mxu1 %v2570_v44  ;;  %v2657_v44 = vld [vmem:[#allocation2 + $0x460] ss:$20 sps:$4 sm:$0xff]   ;;  %p2830_p3 = pnand %p2829_p2, %p2823_p13 }
  0x54   : > { %2418 = vmatpush3.bf16.msra.mxu0 %v2571_v46  ;;  %1753 = vmatpush1.bf16.msra.mxu1 %v2568_v45  ;;  %v2660_v45 = vld [vmem:[#allocation2 + $0xa8] ss:$20 sps:$4 sm:$0xff]  }
  0x55   : > { %2419 = vmatprep.subr.bf16.mxu0 %v2906_v37  ;;  %1754 = vmatprep.subr.bf16.mxu1 %v2574_v47  ;;  %v2665_v46 = vld [vmem:[#allocation2 + $0x43c] ss:$20 sps:$4 sm:$0xff]   ;;  %v2668_v47 = vld [vmem:[#allocation2 + $0x84] ss:$20 sps:$4 sm:$0xff]  }
  0x58   : > { %2420 = vmatpush3.bf16.msra.mxu0 %v2575_v49  ;;  %1755 = vmatpush1.bf16.msra.mxu1 %v2572_v48  ;;  %v2663_v48 = vld [vmem:[#allocation2 + $0x438] ss:$20 sps:$4 sm:$0xff]   ;;  %v2666_v49 = vld [vmem:[#allocation2 + $0x80] ss:$20 sps:$4 sm:$0xff]  }
  0x59   : > { %2421 = vmatprep.subr.bf16.mxu0 %v2906_v37  ;;  %1756 = vmatprep.subr.bf16.mxu1 %v2578_v50  ;;  %v2671_v50 = vld [vmem:[#allocation2 + $0x414] ss:$20 sps:$4 sm:$0xff]  }
  0x5c   : > { %2422 = vmatpush3.bf16.msra.mxu0 %v2579_v52  ;;  %1757 = vmatpush1.bf16.msra.mxu1 %v2576_v51  ;;  %v2674_v51 = vld [vmem:[#allocation2 + $0x5c] ss:$20 sps:$4 sm:$0xff]  }
  0x5d   : > { %2423 = vmatprep.subr.bf16.mxu0 %v2906_v37  ;;  %1758 = vmatprep.subr.bf16.mxu1 %v2582_v53  ;;  %v2669_v52 = vld [vmem:[#allocation2 + $0x410] ss:$20 sps:$4 sm:$0xff]   ;;  %v2672_v53 = vld [vmem:[#allocation2 + $0x58] ss:$20 sps:$4 sm:$0xff]  }
  0x60   : > { %2424 = vmatpush3.bf16.msra.mxu0 %v2583_v55  ;;  %1759 = vmatpush1.bf16.msra.mxu1 %v2580_v54  ;;  %v2677_v54 = vld [vmem:[#allocation2 + $0x3ec] ss:$20 sps:$4 sm:$0xff]   ;;  %v2680_v55 = vld [vmem:[#allocation2 + $0x34] ss:$20 sps:$4 sm:$0xff]  }
  0x61   : > { %2425 = vmatprep.subr.bf16.mxu0 %v2906_v37  ;;  %1760 = vmatprep.subr.bf16.mxu1 %v2586_v56  ;;  %v2648_v37 = vld [vmem:[#allocation2 + $0xf8] ss:$20 sps:$4 sm:$0xff]   ;;  %v2675_v56 = vld [vmem:[#allocation2 + $0x3e8] ss:$20 sps:$4 sm:$0xff]  }
  0x64   : > { %2426 = vmatpush3.bf16.msra.mxu0 %v2587_v58  ;;  %1761 = vmatpush1.bf16.msra.mxu1 %v2584_v57  ;;  %v2678_v57 = vld [vmem:[#allocation2 + $0x30] ss:$20 sps:$4 sm:$0xff]  }
  0x65   : > { %1762 = vmatprep.subr.bf16.mxu1 %v2590_v59  ;;  %1789 = vmatprep.subr.bf16.mxu0 %v2593_v60  ;;  %v2683_v58 = vld [vmem:[#allocation2 + $0x3c4] ss:$20 sps:$4 sm:$0xff]   ;;  %v2686_v59 = vld [vmem:[#allocation2 + $0xc] ss:$20 sps:$4 sm:$0xff]  }
  0x66   : > { %v2681_v60 = vld [vmem:[#allocation2 + $0x3c0] ss:$20 sps:$4 sm:$0xff]  }
  0x67   : > { %2428 = vmatmul.mubr.bf16.vlgmr.msra.gmra.mxu0 %v3116_v34  ;;  %v2647_v34 = vld [vmem:[#allocation2 + $0x4b4] ss:$20 sps:$4 sm:$0xff]  }
  0x68   : > { %1763 = vmatpush2.bf16.msra.mxu1 %v2588_v61  ;;  %1790 = vmatpush1.bf16.msra.mxu0 %v2591_v63  ;;  %v2684_v61 = vld [vmem:[#allocation2 + $0x8] ss:$20 sps:$4 sm:$0xff]   ;;  %v2692_v63 = vld [vmem:[#allocation2 + $0x264] ss:$20 sps:$4 sm:$0xff]  }
  0x69   : > { %1764 = vmatprep.subr.bf16.mxu1 %v2596_v0  ;;  %1791 = vmatprep.subr.bf16.mxu0 %v2599_v1  ;;  %v2695_v0 = vld [vmem:[#allocation2 + $0x3a4] ss:$20 sps:$4 sm:$0xff]  }
  0x6a   : > { %1821 = vmatprep.mubr.bf16.mxu0 %v3156_v22  ;;  %v3165_v1 = vld [vmem:[%s3148_s7 + $0x8] ss:$16 sps:$4 sm:$0xff]  }
  0x6c   : > { %1765 = vmatpush2.bf16.msra.mxu1 %v2594_v2  ;;  %1792 = vmatpush1.bf16.msra.mxu0 %v2597_v3  ;;  %v2690_v2 = vld [vmem:[#allocation2 + $0x260] ss:$20 sps:$4 sm:$0xff]  }
  0x6d   : > { %1766 = vmatprep.subr.bf16.mxu1 %v2602_v4  ;;  %1793 = vmatprep.subr.bf16.mxu0 %v2605_v5  ;;  %v2693_v3 = vld [vmem:[#allocation2 + $0x3a0] ss:$20 sps:$4 sm:$0xff]   ;;  %v2698_v4 = vld [vmem:[#allocation2 + $0x23c] ss:$20 sps:$4 sm:$0xff]  }
  0x6e   : > { %v2701_v5 = vld [vmem:[#allocation2 + $0x37c] ss:$20 sps:$4 sm:$0xff]  }
  0x70   : > { %1767 = vmatpush2.bf16.msra.mxu1 %v2600_v6  ;;  %1794 = vmatpush1.bf16.msra.mxu0 %v2603_v7  ;;  %v2696_v6 = vld [vmem:[#allocation2 + $0x238] ss:$20 sps:$4 sm:$0xff]  }
  0x71   : > { %1768 = vmatprep.subr.bf16.mxu1 %v2608_v8  ;;  %1795 = vmatprep.subr.bf16.mxu0 %v2611_v9  ;;  %v2699_v7 = vld [vmem:[#allocation2 + $0x378] ss:$20 sps:$4 sm:$0xff]   ;;  %v2704_v8 = vld [vmem:[#allocation2 + $0x214] ss:$20 sps:$4 sm:$0xff]  }
  0x72   : > { %v2707_v9 = vld [vmem:[#allocation2 + $0x354] ss:$20 sps:$4 sm:$0xff]  }
  0x74   : > { %1769 = vmatpush2.bf16.msra.mxu1 %v2606_v10  ;;  %1796 = vmatpush1.bf16.msra.mxu0 %v2609_v11  ;;  %v2702_v10 = vld [vmem:[#allocation2 + $0x210] ss:$20 sps:$4 sm:$0xff]  }
  0x75   : > { %1770 = vmatprep.subr.bf16.mxu1 %v2614_v12  ;;  %1797 = vmatprep.subr.bf16.mxu0 %v2617_v13  ;;  %v2705_v11 = vld [vmem:[#allocation2 + $0x350] ss:$20 sps:$4 sm:$0xff]   ;;  %v2710_v12 = vld [vmem:[#allocation2 + $0x1ec] ss:$20 sps:$4 sm:$0xff]  }
  0x76   : > { %v2713_v13 = vld [vmem:[#allocation2 + $0x32c] ss:$20 sps:$4 sm:$0xff]  }
  0x78   : > { %1771 = vmatpush2.bf16.msra.mxu1 %v2612_v14  ;;  %1798 = vmatpush1.bf16.msra.mxu0 %v2615_v15  ;;  %v2708_v14 = vld [vmem:[#allocation2 + $0x1e8] ss:$20 sps:$4 sm:$0xff]  }
  0x79   : > { %1772 = vmatprep.subr.bf16.mxu1 %v2620_v16  ;;  %1799 = vmatprep.subr.bf16.mxu0 %v2623_v17  ;;  %v2711_v15 = vld [vmem:[#allocation2 + $0x328] ss:$20 sps:$4 sm:$0xff]   ;;  %v2716_v16 = vld [vmem:[#allocation2 + $0x1c4] ss:$20 sps:$4 sm:$0xff]  }
  0x7a   : > { %v2719_v17 = vld [vmem:[#allocation2 + $0x304] ss:$20 sps:$4 sm:$0xff]  }
  0x7c   : > { %1773 = vmatpush2.bf16.msra.mxu1 %v2618_v18  ;;  %1800 = vmatpush1.bf16.msra.mxu0 %v2621_v19  ;;  %v2714_v18 = vld [vmem:[#allocation2 + $0x1c0] ss:$20 sps:$4 sm:$0xff]  }
  0x7d   : > { %1774 = vmatprep.subr.bf16.mxu1 %v2626_v20  ;;  %1801 = vmatprep.subr.bf16.mxu0 %v2629_v21  ;;  %v2717_v19 = vld [vmem:[#allocation2 + $0x300] ss:$20 sps:$4 sm:$0xff]   ;;  %v2722_v20 = vld [vmem:[#allocation2 + $0x19c] ss:$20 sps:$4 sm:$0xff]  }
  0x7e   : > { %v2725_v21 = vld [vmem:[#allocation2 + $0x2dc] ss:$20 sps:$4 sm:$0xff]  }
  0x80   : > { %1775 = vmatpush2.bf16.msra.mxu1 %v2624_v23  ;;  %1802 = vmatpush1.bf16.msra.mxu0 %v2627_v24  ;;  %v2720_v23 = vld [vmem:[#allocation2 + $0x198] ss:$20 sps:$4 sm:$0xff]  }
  0x81   : > { %1776 = vmatprep.subr.bf16.mxu1 %v2632_v25  ;;  %1803 = vmatprep.subr.bf16.mxu0 %v2635_v26  ;;  %v2723_v24 = vld [vmem:[#allocation2 + $0x2d8] ss:$20 sps:$4 sm:$0xff]   ;;  %v2728_v25 = vld [vmem:[#allocation2 + $0x174] ss:$20 sps:$4 sm:$0xff]  }
  0x82   : > { %v2731_v26 = vld [vmem:[#allocation2 + $0x2b4] ss:$20 sps:$4 sm:$0xff]  }
  0x84   : > { %1777 = vmatpush2.bf16.msra.mxu1 %v2630_v27  ;;  %1804 = vmatpush1.bf16.msra.mxu0 %v2633_v28  ;;  %v2726_v27 = vld [vmem:[#allocation2 + $0x170] ss:$20 sps:$4 sm:$0xff]  }
  0x85   : > { %1805 = vmatprep.subr.bf16.mxu0 %v2641_v29  ;;  %1832 = vmatprep.subr.bf16.mxu1 %v2644_v30  ;;  %v2729_v28 = vld [vmem:[#allocation2 + $0x2b0] ss:$20 sps:$4 sm:$0xff]   ;;  %v2734_v29 = vld [vmem:[#allocation2 + $0x14c] ss:$20 sps:$4 sm:$0xff]  }
  0x86   : > { %v2737_v30 = vld [vmem:[#allocation2 + $0x28c] ss:$20 sps:$4 sm:$0xff]  }
  0x87   : > { %1779 = vmatmul.mubr.bf16.vlgmr.msra.gmra.mxu1 %v3160_v31 }
  0x88   : > { %1806 = vmatpush2.bf16.msra.mxu0 %v2639_v32  ;;  %1833 = vmatpush1.bf16.msra.mxu1 %v2642_v33  ;;  %v2732_v32 = vld [vmem:[#allocation2 + $0x148] ss:$20 sps:$4 sm:$0xff]  }
  0x89   : > { %1807 = vmatprep.subr.bf16.mxu0 %v2647_v34  ;;  %1834 = vmatprep.subr.bf16.mxu1 %v2650_v35  ;;  %v2735_v33 = vld [vmem:[#allocation2 + $0x288] ss:$20 sps:$4 sm:$0xff]   ;;  %v2740_v34 = vld [vmem:[#allocation2 + $0x4e4] ss:$20 sps:$4 sm:$0xff]  }
  0x8a   : > { %1864 = vmatprep.mubr.bf16.mxu1 %v3151_v62  ;;  %v2741_v35 = vld [vmem:[#allocation2 + $0x268] ss:$20 sps:$4 sm:$0xff]  }
  0x8c   : > { %1808 = vmatpush2.bf16.msra.mxu0 %v2645_v36  ;;  %1835 = vmatpush1.bf16.msra.mxu1 %v2648_v37  ;;  %v2738_v36 = vld [vmem:[#allocation2 + $0x4e0] ss:$20 sps:$4 sm:$0xff]   ;;  %v2742_v37 = vld [vmem:[#allocation2 + $0x128] ss:$20 sps:$4 sm:$0xff]  }
  0x8d   : > { %1809 = vmatprep.subr.bf16.mxu0 %v2653_v38  ;;  %1836 = vmatprep.subr.bf16.mxu1 %v2656_v39  ;;  %v2745_v38 = vld [vmem:[#allocation2 + $0x4bc] ss:$20 sps:$4 sm:$0xff]   ;;  %v2746_v39 = vld [vmem:[#allocation2 + $0x240] ss:$20 sps:$4 sm:$0xff]  }
  0x90   : > { %1810 = vmatpush2.bf16.msra.mxu0 %v2651_v40  ;;  %1837 = vmatpush1.bf16.msra.mxu1 %v2654_v41  ;;  %v2743_v40 = vld [vmem:[#allocation2 + $0x4b8] ss:$20 sps:$4 sm:$0xff]   ;;  %v2747_v41 = vld [vmem:[#allocation2 + $0x100] ss:$20 sps:$4 sm:$0xff]  }
  0x91   : > { %1811 = vmatprep.subr.bf16.mxu0 %v2659_v42  ;;  %1838 = vmatprep.subr.bf16.mxu1 %v2662_v43  ;;  %v2750_v42 = vld [vmem:[#allocation2 + $0x494] ss:$20 sps:$4 sm:$0xff]   ;;  %v2751_v43 = vld [vmem:[#allocation2 + $0x218] ss:$20 sps:$4 sm:$0xff]  }
  0x94   : > { %1812 = vmatpush2.bf16.msra.mxu0 %v2657_v44  ;;  %1839 = vmatpush1.bf16.msra.mxu1 %v2660_v45  ;;  %v2748_v44 = vld [vmem:[#allocation2 + $0x490] ss:$20 sps:$4 sm:$0xff]   ;;  %v2752_v45 = vld [vmem:[#allocation2 + $0xd8] ss:$20 sps:$4 sm:$0xff]  }
  0x95   : > { %1813 = vmatprep.subr.bf16.mxu0 %v2665_v46  ;;  %1840 = vmatprep.subr.bf16.mxu1 %v2668_v47  ;;  %v2755_v46 = vld [vmem:[#allocation2 + $0x46c] ss:$20 sps:$4 sm:$0xff]   ;;  %v2756_v47 = vld [vmem:[#allocation2 + $0x1f0] ss:$20 sps:$4 sm:$0xff]  }
  0x98   : > { %1814 = vmatpush2.bf16.msra.mxu0 %v2663_v48  ;;  %1841 = vmatpush1.bf16.msra.mxu1 %v2666_v49  ;;  %v2753_v48 = vld [vmem:[#allocation2 + $0x468] ss:$20 sps:$4 sm:$0xff]   ;;  %v2757_v49 = vld [vmem:[#allocation2 + $0xb0] ss:$20 sps:$4 sm:$0xff]  }
  0x99   : > { %1815 = vmatprep.subr.bf16.mxu0 %v2671_v50  ;;  %1842 = vmatprep.subr.bf16.mxu1 %v2674_v51  ;;  %v2760_v50 = vld [vmem:[#allocation2 + $0x444] ss:$20 sps:$4 sm:$0xff]   ;;  %v2761_v51 = vld [vmem:[#allocation2 + $0x1c8] ss:$20 sps:$4 sm:$0xff]  }
  0x9c   : > { %1816 = vmatpush2.bf16.msra.mxu0 %v2669_v52  ;;  %1843 = vmatpush1.bf16.msra.mxu1 %v2672_v53  ;;  %v2758_v52 = vld [vmem:[#allocation2 + $0x440] ss:$20 sps:$4 sm:$0xff]   ;;  %v2765_v53 = vld [vmem:[#allocation2 + $0x41c] ss:$20 sps:$4 sm:$0xff]  }
  0x9d   : > { %1817 = vmatprep.subr.bf16.mxu0 %v2677_v54  ;;  %1844 = vmatprep.subr.bf16.mxu1 %v2680_v55  ;;  %v2766_v54 = vld [vmem:[#allocation2 + $0x1a0] ss:$20 sps:$4 sm:$0xff]   ;;  %v2763_v55 = vld [vmem:[#allocation2 + $0x418] ss:$20 sps:$4 sm:$0xff]  }
  0xa0   : > { %1818 = vmatpush2.bf16.msra.mxu0 %v2675_v56  ;;  %1845 = vmatpush1.bf16.msra.mxu1 %v2678_v57  ;;  %v2767_v56 = vld [vmem:[#allocation2 + $0x60] ss:$20 sps:$4 sm:$0xff]  }
  0xa1   : > { %1819 = vmatprep.subr.bf16.mxu0 %v2683_v58  ;;  %1846 = vmatprep.subr.bf16.mxu1 %v2686_v59  ;;  %v2770_v57 = vld [vmem:[#allocation2 + $0x3f4] ss:$20 sps:$4 sm:$0xff]   ;;  %v2771_v58 = vld [vmem:[#allocation2 + $0x178] ss:$20 sps:$4 sm:$0xff]   ;;  %v2768_v59 = vld [vmem:[#allocation2 + $0x3f0] ss:$20 sps:$4 sm:$0xff]  }
  0xa4   : > { %1820 = vmatpush2.bf16.msra.mxu0 %v2681_v60  ;;  %1847 = vmatpush1.bf16.msra.mxu1 %v2684_v61  ;;  %v2772_v60 = vld [vmem:[#allocation2 + $0x38] ss:$20 sps:$4 sm:$0xff]  }
  0xa5   : > { %1848 = vmatprep.subr.bf16.mxu1 %v2692_v63  ;;  %1875 = vmatprep.subr.bf16.mxu0 %v2695_v0  ;;  %v2775_v61 = vld [vmem:[#allocation2 + $0x3cc] ss:$20 sps:$4 sm:$0xff]   ;;  %v2776_v63 = vld [vmem:[#allocation2 + $0x150] ss:$20 sps:$4 sm:$0xff]   ;;  %v2773_v0 = vld [vmem:[#allocation2 + $0x3c8] ss:$20 sps:$4 sm:$0xff]  }
  0xa7   : > { %1822 = vmatmul.mubr.bf16.vlgmr.msra.gmra.mxu0 %v3165_v1 }
  0xa8   : > { %1849 = vmatpush2.bf16.msra.mxu1 %v2690_v2  ;;  %1876 = vmatpush1.bf16.msra.mxu0 %v2693_v3  ;;  %v2777_v2 = vld [vmem:[#allocation2 + $0x10] ss:$20 sps:$4 sm:$0xff]   ;;  %v2778_v3 = vld [vmem:[#allocation2 + $0x4e8] ss:$20 sps:$4 sm:$0xff]  }
  0xa9   : > { %1850 = vmatprep.subr.bf16.mxu1 %v2698_v4  ;;  %1877 = vmatprep.subr.bf16.mxu0 %v2701_v5  ;;  %v2779_v4 = vld [vmem:[#allocation2 + $0x3a8] ss:$20 sps:$4 sm:$0xff]   ;;  %v2780_v5 = vld [vmem:[#allocation2 + $0x4c0] ss:$20 sps:$4 sm:$0xff]  }
  0xaa   : > { %1907 = vmatprep.mubr.bf16.mxu0 %v3156_v22 }
  0xac   : > { %1851 = vmatpush2.bf16.msra.mxu1 %v2696_v6  ;;  %1878 = vmatpush1.bf16.msra.mxu0 %v2699_v7  ;;  %v2781_v6 = vld [vmem:[#allocation2 + $0x380] ss:$20 sps:$4 sm:$0xff]   ;;  %v2782_v7 = vld [vmem:[#allocation2 + $0x498] ss:$20 sps:$4 sm:$0xff]  }
  0xad   : > { %1852 = vmatprep.subr.bf16.mxu1 %v2704_v8  ;;  %1879 = vmatprep.subr.bf16.mxu0 %v2707_v9  ;;  %v2783_v8 = vld [vmem:[#allocation2 + $0x358] ss:$20 sps:$4 sm:$0xff]   ;;  %v2784_v9 = vld [vmem:[#allocation2 + $0x470] ss:$20 sps:$4 sm:$0xff]  }
  0xb0   : > { %1853 = vmatpush2.bf16.msra.mxu1 %v2702_v10  ;;  %1880 = vmatpush1.bf16.msra.mxu0 %v2705_v11  ;;  %v2785_v10 = vld [vmem:[#allocation2 + $0x330] ss:$20 sps:$4 sm:$0xff]   ;;  %v2786_v11 = vld [vmem:[#allocation2 + $0x448] ss:$20 sps:$4 sm:$0xff]  }
  0xb1   : > { %1854 = vmatprep.subr.bf16.mxu1 %v2710_v12  ;;  %1881 = vmatprep.subr.bf16.mxu0 %v2713_v13  ;;  %v2787_v12 = vld [vmem:[#allocation2 + $0x308] ss:$20 sps:$4 sm:$0xff]   ;;  %v2788_v13 = vld [vmem:[#allocation2 + $0x420] ss:$20 sps:$4 sm:$0xff]  }
  0xb4   : > { %1855 = vmatpush2.bf16.msra.mxu1 %v2708_v14  ;;  %1882 = vmatpush1.bf16.msra.mxu0 %v2711_v15  ;;  %v2790_v14 = vld [vmem:[#allocation2 + $0x3f8] ss:$20 sps:$4 sm:$0xff]   ;;  %v2792_v15 = vld [vmem:[#allocation2 + $0x3d0] ss:$20 sps:$4 sm:$0xff]  }
  0xb5   : > { %1856 = vmatprep.subr.bf16.mxu1 %v2716_v16  ;;  %1883 = vmatprep.subr.bf16.mxu0 %v2719_v17  ;;  %v2793_v16 = vld [vmem:[#allocation2 + $0x290] ss:$20 sps:$4 sm:$0xff]  }
  0xb8   : > { %1857 = vmatpush2.bf16.msra.mxu1 %v2714_v18  ;;  %1884 = vmatpush1.bf16.msra.mxu0 %v2717_v19 }
  0xb9   : > { %1858 = vmatprep.subr.bf16.mxu1 %v2722_v20  ;;  %1885 = vmatprep.subr.bf16.mxu0 %v2725_v21 }
  0xbc   : > { %1859 = vmatpush2.bf16.msra.mxu1 %v2720_v23  ;;  %1886 = vmatpush1.bf16.msra.mxu0 %v2723_v24 }
  0xbd   : > { %1860 = vmatprep.subr.bf16.mxu1 %v2728_v25  ;;  %1887 = vmatprep.subr.bf16.mxu0 %v2731_v26 }
  0xc0   : > { %1861 = vmatpush2.bf16.msra.mxu1 %v2726_v27  ;;  %1888 = vmatpush1.bf16.msra.mxu0 %v2729_v28 }
  0xc1   : > { %1862 = vmatprep.subr.bf16.mxu1 %v2734_v29  ;;  %1889 = vmatprep.subr.bf16.mxu0 %v2737_v30 }
  0xc4   : > { %1863 = vmatpush2.bf16.msra.mxu1 %v2732_v32  ;;  %1890 = vmatpush1.bf16.msra.mxu0 %v2735_v33 }
  0xc5   : > { %1891 = vmatprep.subr.bf16.mxu0 %v2740_v34  ;;  %2367 = vmatprep.subr.bf16.mxu1 %v2741_v35 }
  0xc7   : > { %1865 = vmatmul.mubr.bf16.vlgmr.msra.gmra.mxu1 %v3160_v31 }
  0xc8   : > { %1892 = vmatpush2.bf16.msra.mxu0 %v2738_v36  ;;  %2368 = vmatpush3.bf16.msra.mxu1 %v2742_v37 }
  0xc9   : > { %1893 = vmatprep.subr.bf16.mxu0 %v2745_v38  ;;  %2369 = vmatprep.subr.bf16.mxu1 %v2746_v39 }
  0xca   : > { %1950 = vmatprep.mubr.bf16.mxu1 %v3151_v62  ;;  %v2762_v62 = vld [vmem:[#allocation2 + $0x88] ss:$20 sps:$4 sm:$0xff]  }
  0xcc   : > { %1894 = vmatpush2.bf16.msra.mxu0 %v2743_v40  ;;  %2370 = vmatpush3.bf16.msra.mxu1 %v2747_v41 }
  0xcd   : > { %1895 = vmatprep.subr.bf16.mxu0 %v2750_v42  ;;  %2371 = vmatprep.subr.bf16.mxu1 %v2751_v43 }
  0xd0   : > { %1896 = vmatpush2.bf16.msra.mxu0 %v2748_v44  ;;  %2372 = vmatpush3.bf16.msra.mxu1 %v2752_v45 }
  0xd1   : > { %1897 = vmatprep.subr.bf16.mxu0 %v2755_v46  ;;  %2373 = vmatprep.subr.bf16.mxu1 %v2756_v47 }
  0xd4   : > { %1898 = vmatpush2.bf16.msra.mxu0 %v2753_v48  ;;  %2374 = vmatpush3.bf16.msra.mxu1 %v2757_v49 }
  0xd5   : > { %1899 = vmatprep.subr.bf16.mxu0 %v2760_v50  ;;  %2375 = vmatprep.subr.bf16.mxu1 %v2761_v51 }
  0xd8   : > { %1900 = vmatpush2.bf16.msra.mxu0 %v2758_v52  ;;  %2376 = vmatpush3.bf16.msra.mxu1 %v2762_v62 }
  0xd9   : > { %1901 = vmatprep.subr.bf16.mxu0 %v2765_v53  ;;  %2377 = vmatprep.subr.bf16.mxu1 %v2766_v54 }
  0xdc   : > { %1902 = vmatpush2.bf16.msra.mxu0 %v2763_v55  ;;  %2378 = vmatpush3.bf16.msra.mxu1 %v2767_v56 }
  0xdd   : > { %1903 = vmatprep.subr.bf16.mxu0 %v2770_v57  ;;  %2379 = vmatprep.subr.bf16.mxu1 %v2771_v58 }
  0xe0   : > { %1904 = vmatpush2.bf16.msra.mxu0 %v2768_v59  ;;  %2380 = vmatpush3.bf16.msra.mxu1 %v2772_v60 }
  0xe1   : > { %1905 = vmatprep.subr.bf16.mxu0 %v2775_v61  ;;  %2381 = vmatprep.subr.bf16.mxu1 %v2776_v63 }
  0xe4   : > { %1906 = vmatpush2.bf16.msra.mxu0 %v2773_v0  ;;  %2382 = vmatpush3.bf16.msra.mxu1 %v2777_v2 }
  0xe5   : > { %2389 = vmatprep.subr.bf16.mxu0 %v2778_v3 }
  0xe7   : > { %1908 = vmatmul.mubr.bf16.vlgmr.msra.gmra.mxu0 %v3165_v1  ;;  %1951 = vmatmul.mubr.bf16.vlgmr.msra.gmra.mxu1 %v3160_v31  ;;  %v2789_v31 = vld [vmem:[#allocation2 + $0x2e0] ss:$20 sps:$4 sm:$0xff]  }
  0xe8   : > { %2390 = vmatpush3.bf16.msra.mxu0 %v2779_v4  ;;  %1991 = vmatprep.mubr.bf16.mxu0 %v3156_v22  ;;  %v2791_v22 = vld [vmem:[#allocation2 + $0x2b8] ss:$20 sps:$4 sm:$0xff]  }
  0xe9   : > { %2391 = vmatprep.subr.bf16.mxu0 %v2780_v5 }
  0xec   : > { %2392 = vmatpush3.bf16.msra.mxu0 %v2781_v6 }
  0xed   : > { %2393 = vmatprep.subr.bf16.mxu0 %v2782_v7 }
  0xf0   : > { %2394 = vmatpush3.bf16.msra.mxu0 %v2783_v8 }
  0xf1   : > { %2395 = vmatprep.subr.bf16.mxu0 %v2784_v9 }
  0xf4   : > { %2396 = vmatpush3.bf16.msra.mxu0 %v2785_v10 }
  0xf5   : > { %2397 = vmatprep.subr.bf16.mxu0 %v2786_v11 }
  0xf8   : > { %2398 = vmatpush3.bf16.msra.mxu0 %v2787_v12 }
  0xf9   : > { %2399 = vmatprep.subr.bf16.mxu0 %v2788_v13 }
  0xfc   : > { %2400 = vmatpush3.bf16.msra.mxu0 %v2789_v31 }
  0xfd   : > { %2401 = vmatprep.subr.bf16.mxu0 %v2790_v14 }
 0x100   : > { %2402 = vmatpush3.bf16.msra.mxu0 %v2791_v22 }
 0x101   : > { %2403 = vmatprep.subr.bf16.mxu0 %v2792_v15 }
 0x104   : > { %2404 = vmatpush3.bf16.msra.mxu0 %v2793_v16 }
 0x107   : > { %1992 = vmatmul.mubr.bf16.vlgmr.msra.gmra.mxu0 %v3165_v1  ;;  %v801_v17 = vpop.f32.mrf.mxu0  ;;  %v844_v26 = vpop.f32.mrf.mxu1 }
 0x109   : > { %v803_v18 = vpop.f32.mrf.mxu0  ;;  %v846_v27 = vpop.f32.mrf.mxu1 }
 0x10b   : > { %v805_v19 = vpop.f32.mrf.mxu0  ;;  %v848_v28 = vpop.f32.mrf.mxu1 }
 0x10d   : > { %v807_v20 = vpop.f32.mrf.mxu0  ;;  %v850_v29 = vpop.f32.mrf.mxu1 }
 0x127   : > { %v887_v21 = vpop.f32.mrf.mxu0 }
 0x129   : > { %v2429_v23 = vpop.f32.mrf.mxu0 }
 0x12b   : > { %v3175_v24 = vpop.f32.mrf.mxu0 }
 0x12d   : > { %v2430_v25 = vpop.f32.mrf.mxu0 }
 0x147   : > { %v1780_v30 = vpop.f32.mrf.mxu1 }
 0x148   : > { %v1781_v33 = vadd.f32 %v1780_v30, %v801_v17 }
 0x149   : > { %v1782_v32 = vpop.f32.mrf.mxu1 }
 0x14a   : > { %v1783_v35 = vadd.f32 %v1782_v32, %v803_v18 }
 0x14b   : > { %v1784_v1 = vpop.f32.mrf.mxu1 }
 0x14c   : > { %v1785_v39 = vadd.f32 %v1784_v1, %v805_v19 }
 0x14d   : > { %v1786_v37 = vpop.f32.mrf.mxu1 }
 0x14e   : > { %v1787_v42 = vadd.f32 %v1786_v37, %v807_v20 }
 0x167   : > { %v1823_v34 = vpop.f32.mrf.mxu0 }
 0x168   : > { %v1824_v36 = vadd.f32 %v1823_v34, %v1781_v33 }
 0x169   : > { %v1825_v38 = vpop.f32.mrf.mxu0 }
 0x16a   : > { %2000 = vst [vmem:[%s3180_s10] sm:$0xff] %v1824_v36  ;;  %v1826_v40 = vadd.f32 %v1825_v38, %v1783_v35 }
 0x16b   : > { %v1827_v41 = vpop.f32.mrf.mxu0 }
 0x16c   : > { %2001 = vst [vmem:[%s3180_s10 + $0x8] sm:$0xff] %v1826_v40  ;;  %v1828_v43 = vadd.f32 %v1827_v41, %v1785_v39 }
 0x16d   : > { %v1829_v44 = vpop.f32.mrf.mxu0 }
 0x16e   : > { %2005 = vst [vmem:[%s3180_s10 + $0x28] sm:$0xff] %v1828_v43  ;;  %v1830_v45 = vadd.f32 %v1829_v44, %v1787_v42 }
 0x170   : > { %2006 = vst [vmem:[%s3180_s10 + $0x30] sm:$0xff] %v1830_v45 }
 0x187   : > { %v1866_v46 = vpop.f32.mrf.mxu1 }
 0x188   : > { %v1867_v49 = vadd.f32 %v1866_v46, %v844_v26 }
 0x189   : > { %v1868_v47 = vpop.f32.mrf.mxu1 }
 0x18a   : > { %v1869_v51 = vadd.f32 %v1868_v47, %v846_v27 }
 0x18b   : > { %v1870_v48 = vpop.f32.mrf.mxu1 }
 0x18c   : > { %v1871_v54 = vadd.f32 %v1870_v48, %v848_v28 }
 0x18d   : > { %v1872_v62 = vpop.f32.mrf.mxu1 }
 0x18e   : > { %v1873_v57 = vadd.f32 %v1872_v62, %v850_v29 }
 0x1a7   : > { %v1909_v50 = vpop.f32.mrf.mxu0  ;;  %v2383_v61 = vpop.f32.mrf.mxu1 }
 0x1a8   : > { %v1910_v52 = vadd.f32 %v1909_v50, %v1867_v49 }
 0x1a9   : > { %v1911_v53 = vpop.f32.mrf.mxu0  ;;  %v2384_v63 = vpop.f32.mrf.mxu1 }
 0x1aa   : > { %2002 = vst [vmem:[%s3180_s10 + $0x10] sm:$0xff] %v1910_v52  ;;  %v1912_v55 = vadd.f32 %v1911_v53, %v1869_v51  ;;  %v2385_v2 = vadd.f32 %v2384_v63, %v2383_v61 }
 0x1ab   : > { %v1913_v56 = vpop.f32.mrf.mxu0  ;;  %v2386_v0 = vpop.f32.mrf.mxu1 }
 0x1ac   : > { %2003 = vst [vmem:[%s3180_s10 + $0x18] sm:$0xff] %v1912_v55  ;;  %v1914_v58 = vadd.f32 %v1913_v56, %v1871_v54  ;;  %v1953_v6 = vadd.f32 %v2385_v2, %v887_v21 }
 0x1ad   : > { %v1915_v59 = vpop.f32.mrf.mxu0  ;;  %v2387_v3 = vpop.f32.mrf.mxu1 }
 0x1ae   : > { %2007 = vst [vmem:[%s3180_s10 + $0x38] sm:$0xff] %v1914_v58  ;;  %v1916_v60 = vadd.f32 %v1915_v59, %v1873_v57  ;;  %v2388_v7 = vadd.f32 %v2387_v3, %v2386_v0 }
 0x1b0   : > { %2008 = vst [vmem:[%s3180_s10 + $0x40] sm:$0xff] %v1916_v60  ;;  %v1956_v12 = vadd.f32 %v2388_v7, %v3175_v24 }
 0x1c7   : > { %v2405_v4 = vpop.f32.mrf.mxu0 }
 0x1c9   : > { %v2406_v5 = vpop.f32.mrf.mxu0 }
 0x1ca   : > { %v2407_v8 = vadd.f32 %v2406_v5, %v2405_v4 }
 0x1cb   : > { %v2408_v9 = vpop.f32.mrf.mxu0 }
 0x1cc   : > { %v1994_v10 = vadd.f32 %v2407_v8, %v1953_v6 }
 0x1cd   : > { %v2409_v11 = vpop.f32.mrf.mxu0 }
 0x1ce   : > { %2004 = vst [vmem:[%s3180_s10 + $0x20] sm:$0xff] %v1994_v10  ;;  %v2410_v13 = vadd.f32 %v2409_v11, %v2408_v9 }
 0x1d0   : > { %v1997_v31 = vadd.f32 %v2410_v13, %v1956_v12 }
 0x1d2   : > { %2009 = vst [vmem:[%s3180_s10 + $0x48] sm:$0xff] %v1997_v31 }
 0x1d3   : > { %2833 = shalt.err (!%p2830_p3)
}
 0x1d4   : > { %s2834_s5 = scalar_lea.hbm %s3197_s14, 1280  ;;  %s2838_s7 = scalar_lea.hbm %s3253_s4, 10240 }
 0x1d5   : > { %p2835_p5 = scmp.ne.s32.totalorder %s3197_s14, %s2834_s5  ;;  %p2839_p9 = scmp.lt.s32.totalorder %s3197_s14, %s3253_s4 }
 0x1d6   : > { %p2840_p10 = scmp.lt.s32.totalorder %s2838_s7, %s2834_s5 }
 0x1d7   : > { %p2836_p6 = pnand %p2835_p5, %p2976_p4 }
 0x1d8   : > { %p2841_p11 = por %p2840_p10, %p2839_p9 }
 0x1d9   : > { %p2837_p7 = pneg %p2836_p6 }
 0x1db   : > { %p2842_p12 = pnand %p2841_p11, %p2837_p7 }
 0x1dd   : > { %2845 = shalt.err (!%p2842_p12)
}
 0x1de   : > { %s2909_s10 = smov 640   ;;  %s2910_s11 = smov 40  }
 0x1df   : > { %2438 = dma.vmem_to_hbm [thread:$0]  (%p2976_p4), %s3199_s9, 1280, %s3197_s14, %s3204_s18, %s2909_s10, %s2909_s10, %s2910_s11  }
 0x1e0 PF: > { %p2450_p13 = scmp.ge.s32.totalorder %s2900_s20, 2  ;;  %s2042_s12 = sand.u32 1, %s2880_s15  }
 0x1e1   : > { %s2043_s13 = scalar_lea.sflag [#allocation4], %s2042_s12 }
 0x1e2   : > { %p2445_p0 = pnand %p2450_p13, %p2983_p8 }
 0x1e4   : > { %p2446_p1 = pneg %p2445_p0 }
 0x1e6   : > { %2875 = dma.done.wait (%p2446_p1), %s2043_s13, 1280  }
 0x1e7   : > { %2877 = vsyncadd (%p2446_p1), %s2043_s13, 4294966016  ;;  %s18_s20 = sadd.s32 1, %s2900_s20   ;;  %s3258_s15 = smov %s2884_s16 }
 0x1e8   : > { %p15_p2 = scmp.ge.s32.totalorder %s18_s20, 10   ;;  %s3259_s16 = smov %s2888_s17 }
 0x1e9   : > { %s3260_s17 = smov %s2989_s28  ;;  %s3261_s18 = smov %s2896_s19 }
 0x1ea   : > { %s3262_s19 = smov %s3264_s23  ;;  %17 = sbr.rel (!%p15_p2) target bundleno = 5 (0x5), region = 79 }
 0x1ef   :  { %2048 = vsyncpa [#allocation3], 1 }
 0x1f0   :  { %2050 = vsyncpa [#allocation3 + $0x1], 1 }
 0x1f1   :  { %2051 = vsyncpa [#allocation4], 1 }
 0x1f2   :  { %2053 = vsyncpa [#allocation4 + $0x1], 1 }

</bundles_post_ra>
